<compile_context>
chip_gen: v7x
topology: tpu7x:2x2x1
jax: 0.10.0
libtpu: 0.0.40
codegen_flags: <defaults>
</compile_context>

<pallas_src>
import functools

import jax
import jax.numpy as jnp
from jax import lax
from jax.experimental import pallas as pl
from jax.experimental.pallas import tpu as pltpu

IGNORE_LABEL = -1


def _ppc_kernel(logits_ref, tgt_ref, loss_ref, count_ref, *, ignore_label, n_rows):
    # logits_ref: (TM, C) native dtype (bf16/f32); upcast in VMEM for the math.
    x = logits_ref[...].astype(jnp.float32)                   # (TM, C) f32
    tgt = tgt_ref[...]                                        # (TM, 1) i32
    tm, c = x.shape

    # Mask: row must carry a non-ignored target AND be inside the real array
    # (the last grid tile may extend past N; its OOB rows hold garbage).
    row_idx = pl.program_id(0) * tm + lax.broadcasted_iota(jnp.int32, (tm, 1), 0)
    valid = (tgt != ignore_label) & (row_idx < n_rows)        # (TM, 1) bool

    # Numerically stable logsumexp over the class (lane) dimension, reusing the
    # centered values for the gather:  lse - x[t] = log(sum exp(x - m)) - (x[t] - m).
    m = jnp.max(x, axis=-1, keepdims=True)                    # (TM, 1)
    z = x - m                                                 # (TM, C)
    sum_exp = jnp.sum(jnp.exp(z), axis=-1, keepdims=True)     # (TM, 1)

    # Gather z[i, tgt[i]] via one-hot compare + masked row-sum.
    # TODO(synk): non-ignored targets outside [0, C) silently gather 0 here
    #             (torch would raise); add a debug_check/flag if callers need it.
    col = lax.broadcasted_iota(jnp.int32, (tm, c), 1)
    z_t = jnp.sum(jnp.where(col == tgt, z, 0.0), axis=-1, keepdims=True)

    per_row = jnp.log(sum_exp) - z_t                          # (TM, 1) f32

    # Per-tile partial reduction (per-row NaNs from garbage OOB rows are discarded
    # by the where, never summed).  Broadcast-fill the whole (1, 8, 128) output
    # block so the store is a full-width unmasked vst.
    loss_sum = jnp.sum(jnp.where(valid, per_row, 0.0))
    n_valid = jnp.sum(valid.astype(jnp.int32))
    loss_ref[...] = jnp.full(loss_ref.shape, loss_sum, loss_ref.dtype)
    count_ref[...] = jnp.full(count_ref.shape, n_valid, count_ref.dtype)


def ppc_loss(contrast_logits, contrast_target, *, ignore_label=IGNORE_LABEL,
             tile_rows=None, vmem_budget_bytes=24 * 1024 * 1024):
    """Cross-entropy with ignore_index (mean over valid rows), Pallas TPU kernel."""
    n, c = contrast_logits.shape
    tgt = contrast_target.astype(jnp.int32).reshape(n, 1)

    # Row-tile sizing: budget the full VMEM working set per element of the tile:
    #   2x double-buffered native input  +  ~3 full-width f32 temporaries.
    # Keeping this <= ~24 MiB fits v7x's scoped VMEM while giving 3-5 MiB native
    # tiles at C=128 (well past the ~1-2 MiB needed to hit ~85% of HBM roofline).
    itemsize = contrast_logits.dtype.itemsize
    bytes_per_elem = 2 * itemsize + 3 * 4
    max_elems = max(1, vmem_budget_bytes // bytes_per_elem)
    tm = max(8, (max_elems // max(1, c)) // 8 * 8)
    if tile_rows is not None:
        tm = min(tm, max(8, (int(tile_rows) + 7) // 8 * 8))
    tm = min(tm, max(8, pl.cdiv(n, 8) * 8))        # never exceed the problem size

    num_tiles = pl.cdiv(n, tm)                     # NO padding of the logits

    loss_p, count_p = pl.pallas_call(
        functools.partial(_ppc_kernel, ignore_label=ignore_label, n_rows=n),
        out_shape=(jax.ShapeDtypeStruct((num_tiles, 8, 128), jnp.float32),
                   jax.ShapeDtypeStruct((num_tiles, 8, 128), jnp.int32)),
        grid_spec=pltpu.PrefetchScalarGridSpec(
            num_scalar_prefetch=0,
            grid=(num_tiles,),
            in_specs=[
                pl.BlockSpec((tm, c), lambda i: (i, 0)),   # logits tile (native dtype)
                pl.BlockSpec((tm, 1), lambda i: (i, 0)),   # targets column
            ],
            out_specs=[
                pl.BlockSpec((1, 8, 128), lambda i: (i, 0, 0)),   # loss partial
                pl.BlockSpec((1, 8, 128), lambda i: (i, 0, 0)),   # valid-count partial
            ],
        ),
        compiler_params=pltpu.CompilerParams(
            dimension_semantics=("parallel",),     # independent tiles (megacore on v7x)
            vmem_limit_bytes=48 * 1024 * 1024,     # > budget, < v7x 64 MiB physical
        ),
    )(contrast_logits, tgt)

    # Tiny final reduction over num_tiles scalars; 0/0 -> nan matches torch when
    # every target is ignored.  Counts are exact int32.
    total_loss = jnp.sum(loss_p[:, 0, 0])
    total_valid = jnp.sum(count_p[:, 0, 0]).astype(jnp.float32)
    return total_loss / total_valid


def ppc_loss_ref(contrast_logits, contrast_target, ignore_label=IGNORE_LABEL):
    x = contrast_logits.astype(jnp.float32)
    valid = contrast_target != ignore_label
    lse = jax.scipy.special.logsumexp(x, axis=-1)
    safe_t = jnp.clip(contrast_target, 0, x.shape[1] - 1).astype(jnp.int32)
    gathered = jnp.take_along_axis(x, safe_t[:, None], axis=1)[:, 0]
    per = lse - gathered
    return jnp.sum(jnp.where(valid, per, 0.0)) / jnp.sum(valid)


if __name__ == "__main__":
    key = jax.random.PRNGKey(0)
    k1, k2, k3 = jax.random.split(key, 3)

    # Small synthetic shapes consistent with the module: 200 pixels, 128 prototypes.
    N, C = 200, 128
    contrast_logits = jax.random.normal(k1, (N, C), dtype=jnp.float32)
    contrast_target = jax.random.randint(k2, (N,), 0, C, dtype=jnp.int32)
    ignore_mask = jax.random.bernoulli(k3, 0.25, (N,))
    contrast_target = jnp.where(ignore_mask, IGNORE_LABEL, contrast_target)

    ref = ppc_loss_ref(contrast_logits, contrast_target)

    # f32 path, single tile (tile covers all rows).
    loss = ppc_loss(contrast_logits, contrast_target)
    jax.block_until_ready(loss)
    assert jnp.allclose(loss, ref, rtol=1e-5, atol=1e-5), (loss, ref)

    # Multi-tile + ragged-last-tile path (exercises in-kernel bounds masking,
    # no wrapper-side padding of the logits).
    loss_ragged = ppc_loss(contrast_logits, contrast_target, tile_rows=64)
    jax.block_until_ready(loss_ragged)
    assert jnp.allclose(loss_ragged, ref, rtol=1e-5, atol=1e-5), (loss_ragged, ref)

    # bf16 streaming path: no wrapper pre-cast, kernel upcasts to f32 in VMEM.
    logits_bf16 = contrast_logits.astype(jnp.bfloat16)
    loss_bf16 = ppc_loss(logits_bf16, contrast_target)
    jax.block_until_ready(loss_bf16)
    ref_bf16 = ppc_loss_ref(logits_bf16.astype(jnp.float32), contrast_target)
    assert jnp.allclose(loss_bf16, ref_bf16, rtol=1e-4, atol=1e-4), (loss_bf16, ref_bf16)

    print("KERNEL_OK")
</pallas_src>

<mosaic_0001>
module attributes {stable_mosaic.version = 11 : i64} {
  func.func @_ppc_kernel(%arg0: i32, %arg1: memref<200x128xf32, #tpu.memory_space<vmem>>, %arg2: memref<200x1xi32, #tpu.memory_space<vmem>>, %arg3: memref<1x8x128xf32, #tpu.memory_space<vmem>>, %arg4: memref<1x8x128xi32, #tpu.memory_space<vmem>>) attributes {dimension_semantics = [#tpu.dimension_semantics<parallel>], iteration_bounds = array<i64: 1>, scalar_prefetch = 0 : i64, scratch_operands = 0 : i64, tpu.core_type = #tpu.core_type<tc>, window_params = [{transform_indices = @transform_0, window_bounds = array<i64: 200, 128>}, {transform_indices = @transform_1, window_bounds = array<i64: 200, 1>}, {transform_indices = @transform_2, window_bounds = array<i64: 1, 8, 128>}, {transform_indices = @transform_3, window_bounds = array<i64: 1, 8, 128>}]} {
    %c0 = arith.constant 0 : index
    %c0_0 = arith.constant 0 : index
    %0 = vector.load %arg1[%c0, %c0_0] : memref<200x128xf32, #tpu.memory_space<vmem>>, vector<200x128xf32>
    %c0_1 = arith.constant 0 : index
    %c0_2 = arith.constant 0 : index
    %1 = vector.load %arg2[%c0_1, %c0_2] : memref<200x1xi32, #tpu.memory_space<vmem>>, vector<200x1xi32>
    %c200_i32 = arith.constant 200 : i32
    %2 = arith.muli %arg0, %c200_i32 : i32
    %3 = tpu.iota {dimensions = array<i32: 0>} : vector<200x1xi32>
    %4 = vector.broadcast %2 : i32 to vector<200x1xi32>
    %5 = arith.addi %4, %3 : vector<200x1xi32>
    %c-1_i32 = arith.constant -1 : i32
    %6 = vector.broadcast %c-1_i32 : i32 to vector<200x1xi32>
    %7 = arith.cmpi ne, %1, %6 : vector<200x1xi32>
    %c200_i32_3 = arith.constant 200 : i32
    %8 = vector.broadcast %c200_i32_3 : i32 to vector<200x1xi32>
    %9 = arith.cmpi slt, %5, %8 : vector<200x1xi32>
    %10 = arith.andi %7, %9 : vector<200x1xi1>
    %cst = arith.constant dense<0xFF800000> : vector<200xf32>
    %11 = vector.multi_reduction <maximumf>, %0, %cst [1] : vector<200x128xf32> to vector<200xf32>
    %12 = vector.shape_cast %11 : vector<200xf32> to vector<200x1xf32>
    %13 = vector.broadcast %12 : vector<200x1xf32> to vector<200x128xf32>
    %14 = arith.subf %0, %13 : vector<200x128xf32>
    %15 = math.exp %14 : vector<200x128xf32>
    %cst_4 = arith.constant dense<0.000000e+00> : vector<200xf32>
    %16 = vector.multi_reduction <add>, %15, %cst_4 [1] : vector<200x128xf32> to vector<200xf32>
    %17 = vector.shape_cast %16 : vector<200xf32> to vector<200x1xf32>
    %18 = tpu.iota {dimensions = array<i32: 1>} : vector<200x128xi32>
    %19 = vector.broadcast %1 : vector<200x1xi32> to vector<200x128xi32>
    %20 = arith.cmpi eq, %18, %19 : vector<200x128xi32>
    %cst_5 = arith.constant 0.000000e+00 : f32
    %21 = vector.broadcast %cst_5 : f32 to vector<200x128xf32>
    %22 = arith.select %20, %14, %21 : vector<200x128xi1>, vector<200x128xf32>
    %cst_6 = arith.constant dense<0.000000e+00> : vector<200xf32>
    %23 = vector.multi_reduction <add>, %22, %cst_6 [1] : vector<200x128xf32> to vector<200xf32>
    %24 = vector.shape_cast %23 : vector<200xf32> to vector<200x1xf32>
    %25 = math.log %17 : vector<200x1xf32>
    %26 = arith.subf %25, %24 : vector<200x1xf32>
    %cst_7 = arith.constant 0.000000e+00 : f32
    %27 = vector.broadcast %cst_7 : f32 to vector<200x1xf32>
    %28 = arith.select %10, %26, %27 : vector<200x1xi1>, vector<200x1xf32>
    %29 = vector.shape_cast %28 : vector<200x1xf32> to vector<1x200x1xf32>
    %cst_8 = arith.constant dense<0.000000e+00> : vector<1xf32>
    %30 = vector.multi_reduction <add>, %29, %cst_8 [1, 2] : vector<1x200x1xf32> to vector<1xf32>
    %31 = vector.shape_cast %30 : vector<1xf32> to vector<1x1x1xf32>
    %32 = vector.extract %31[0, 0, 0] : f32 from vector<1x1x1xf32>
    %33 = arith.extui %10 : vector<200x1xi1> to vector<200x1xi32>
    %34 = vector.shape_cast %33 : vector<200x1xi32> to vector<1x200x1xi32>
    %cst_9 = arith.constant dense<0> : vector<1xi32>
    %35 = vector.multi_reduction <add>, %34, %cst_9 [1, 2] : vector<1x200x1xi32> to vector<1xi32>
    %36 = vector.shape_cast %35 : vector<1xi32> to vector<1x1x1xi32>
    %37 = vector.extract %36[0, 0, 0] : i32 from vector<1x1x1xi32>
    %38 = vector.broadcast %32 : f32 to vector<1x8x128xf32>
    %c0_10 = arith.constant 0 : index
    %c0_11 = arith.constant 0 : index
    %c0_12 = arith.constant 0 : index
    %39 = vector.load %arg3[%c0_10, %c0_11, %c0_12] : memref<1x8x128xf32, #tpu.memory_space<vmem>>, vector<1x8x128xf32>
    tpu.vector_store %arg3[%c0_10, %c0_11, %c0_12], %38 {strides = array<i32>} : memref<1x8x128xf32, #tpu.memory_space<vmem>>, vector<1x8x128xf32>,
    %40 = vector.broadcast %37 : i32 to vector<1x8x128xi32>
    %c0_13 = arith.constant 0 : index
    %c0_14 = arith.constant 0 : index
    %c0_15 = arith.constant 0 : index
    %41 = vector.load %arg4[%c0_13, %c0_14, %c0_15] : memref<1x8x128xi32, #tpu.memory_space<vmem>>, vector<1x8x128xi32>
    tpu.vector_store %arg4[%c0_13, %c0_14, %c0_15], %40 {strides = array<i32>} : memref<1x8x128xi32, #tpu.memory_space<vmem>>, vector<1x8x128xi32>,
    return
  }
  func.func @transform_0(%arg0: i32) -> (i32, i32) {
    %c0_i32 = arith.constant 0 : i32
    %c0_i32_0 = arith.constant 0 : i32
    return %arg0, %c0_i32 : i32, i32
  }
  func.func @transform_1(%arg0: i32) -> (i32, i32) {
    %c0_i32 = arith.constant 0 : i32
    %c0_i32_0 = arith.constant 0 : i32
    return %arg0, %c0_i32 : i32, i32
  }
  func.func @transform_2(%arg0: i32) -> (i32, i32, i32) {
    %c0_i32 = arith.constant 0 : i32
    %c0_i32_0 = arith.constant 0 : i32
    %c0_i32_1 = arith.constant 0 : i32
    return %arg0, %c0_i32, %c0_i32_0 : i32, i32, i32
  }
  func.func @transform_3(%arg0: i32) -> (i32, i32, i32) {
    %c0_i32 = arith.constant 0 : i32
    %c0_i32_0 = arith.constant 0 : i32
    %c0_i32_1 = arith.constant 0 : i32
    return %arg0, %c0_i32, %c0_i32_0 : i32, i32, i32
  }
}

</mosaic_0001>

<bundles_post_ra>
// kernel: tpu_custom_call.1
= control target key start
LH: loop header
LB: loop body
LE: loop exit
PB: predicated region body
PF: predicated region fallthrough
CT: control target
= control target key end

     0   :  { %9 = vsyncpa [#allocation3], 0  ;;  %v1746_v4 = vmov 0   ;;  %s1742_s0 = inlined_call_operand.vmem [shape: f32[200,128], index: 0, kind: input, shape index: {}]   ;;  %s1743_s1 = inlined_call_operand.vmem [shape: s32[200,1], index: 1, kind: input, shape index: {}]   ;;  %s1744_s2 = inlined_call_operand.hbm [shape: f32[1,8,128], index: 2, kind: output, shape index: {0}]   ;;  %s1745_s3 = inlined_call_operand.hbm [shape: s32[1,8,128], index: 3, kind: output, shape index: {1}]  }
   0x1   :  { %v1012_v0 = vld [vmem:[%s1742_s0 + $0x10] sm:$0xff]  ;;  %v1017_v1 = vld [vmem:[%s1742_s0] sm:$0xff]  ;;  %v1024_v2 = vld [vmem:[%s1742_s0 + $0x18] sm:$0xff]  ;;  %837 = vset.pattern.permute.xlu1 %v1746_v4  ;;  %836 = vset.pattern.permute.xlu0 %v1746_v4 }
   0x2   :  { %197 = vmax.xlane.f32.xlu1 %v1012_v0  ;;  %193 = vmax.xlane.f32.xlu0 %v1017_v1  ;;  %v1029_v3 = vld [vmem:[%s1742_s0 + $0x8] sm:$0xff]  ;;  %v1043_v6 = vld [vmem:[%s1742_s0 + $0x20] sm:$0xff]  ;;  %v1050_v7 = vld [vmem:[%s1742_s0 + $0x38] sm:$0xff] }
   0x3   :  { %v1038_v5 = vld [vmem:[%s1742_s0 + $0x28] sm:$0xff]  ;;  %v1055_v8 = vld [vmem:[%s1742_s0 + $0x30] sm:$0xff]  ;;  %v1067_v10 = vld [vmem:[%s1742_s0 + $0x40] sm:$0xff] }
   0x4   :  { %v1062_v9 = vld [vmem:[%s1742_s0 + $0x48] sm:$0xff]  ;;  %v1074_v11 = vld [vmem:[%s1742_s0 + $0x58] sm:$0xff]  ;;  %v1079_v12 = vld [vmem:[%s1742_s0 + $0x50] sm:$0xff] }
   0x6   :  { %199 = vmax.xlane.f32.xlu1 %v1024_v2  ;;  %195 = vmax.xlane.f32.xlu0 %v1029_v3 }
   0xa   :  { %203 = vmax.xlane.f32.xlu1 %v1038_v5  ;;  %201 = vmax.xlane.f32.xlu0 %v1043_v6 }
   0xe   :  { %207 = vmax.xlane.f32.xlu1 %v1050_v7  ;;  %205 = vmax.xlane.f32.xlu0 %v1055_v8 }
  0x12   :  { %211 = vmax.xlane.f32.xlu1 %v1062_v9  ;;  %209 = vmax.xlane.f32.xlu0 %v1067_v10 }
  0x13   :  { %10 = vsyncpa [#allocation5], 0  ;;  %v1086_v13 = vld [vmem:[%s1742_s0 + $0x68] sm:$0xff]  ;;  %v1091_v14 = vld [vmem:[%s1742_s0 + $0x60] sm:$0xff]  ;;  %vm645_vm15 = vcmask 7168   ;;  %s988_s30 = smov [#allocation4]  }
  0x14   :  { %v1098_v15 = vld [vmem:[%s1742_s0 + $0x78] sm:$0xff]  ;;  %v1103_v16 = vld [vmem:[%s1742_s0 + $0x70] sm:$0xff]  ;;  %v1110_v17 = vld [vmem:[%s1742_s0 + $0x88] sm:$0xff]  ;;  %s817_s4 = sshll.u32 %s988_s30, 4  ;;  %s1711_s4 = int_to_ptr.vmem [resolvable:$true] %s817_s4 }
  0x15   :  { %v1115_v18 = vld [vmem:[%s1742_s0 + $0x80] sm:$0xff]  ;;  %v1122_v19 = vld [vmem:[%s1742_s0 + $0x90] sm:$0xff]  ;;  %v1127_v20 = vld [vmem:[%s1742_s0 + $0x98] sm:$0xff] }
  0x16   :  { %215 = vmax.xlane.f32.xlu1 %v1074_v11  ;;  %213 = vmax.xlane.f32.xlu0 %v1079_v12  ;;  %v1134_v21 = vld [vmem:[%s1742_s0 + $0xa0] sm:$0xff]  ;;  %v1139_v22 = vld [vmem:[%s1742_s0 + $0xa8] sm:$0xff]  ;;  %v1146_v23 = vld [vmem:[%s1742_s0 + $0xb0] sm:$0xff] }
  0x17   :  { %v1151_v24 = vld [vmem:[%s1742_s0 + $0xb8] sm:$0xff]  ;;  %v1158_v25 = vld [vmem:[%s1742_s0 + $0xc0] sm:$0xff]  ;;  %v1164_v26 = vld [vmem:[%s1743_s1 + $0x8] sm:$0xff] }
  0x18   :  { %v1169_v27 = vld [vmem:[%s1743_s1] sm:$0xff]  ;;  %v1176_v28 = vld [vmem:[%s1743_s1 + $0x18] sm:$0xff]  ;;  %v1181_v29 = vld [vmem:[%s1743_s1 + $0x10] sm:$0xff]  ;;  %vm119_vm14 = vcmp.ne.s32.totalorder %v1164_v26, 4294967295 }
  0x19   :  { %v1188_v30 = vld [vmem:[%s1743_s1 + $0x28] sm:$0xff]  ;;  %v1193_v31 = vld [vmem:[%s1743_s1 + $0x20] sm:$0xff]  ;;  %v1200_v32 = vld [vmem:[%s1743_s1 + $0x38] sm:$0xff] }
  0x1a   :  { %219 = vmax.xlane.f32.xlu1 %v1086_v13  ;;  %217 = vmax.xlane.f32.xlu0 %v1091_v14  ;;  %v1205_v33 = vld [vmem:[%s1743_s1 + $0x30] sm:$0xff]  ;;  %v1212_v34 = vld [vmem:[%s1743_s1 + $0x58] sm:$0xff]  ;;  %v1217_v35 = vld [vmem:[%s1743_s1 + $0x40] sm:$0xff] }
  0x1b   :  { %v1224_v36 = vld [vmem:[%s1743_s1 + $0x80] sm:$0xff]  ;;  %v1229_v37 = vld [vmem:[%s1743_s1 + $0x48] sm:$0xff]  ;;  %v1236_v38 = vld [vmem:[%s1743_s1 + $0x90] sm:$0xff] }
  0x1c   :  { %1782 = vst [vmem:[#allocation8_spill] sm:$0xff] %v1236_v38  ;;  %v1241_v39 = vld [vmem:[%s1743_s1 + $0x50] sm:$0xff]  ;;  %v1248_v40 = vld [vmem:[%s1743_s1 + $0xa0] sm:$0xff]  ;;  %v1265_v43 = vld [vmem:[%s1743_s1 + $0x68] sm:$0xff] }
  0x1d   :  { %v1253_v41 = vld [vmem:[%s1743_s1 + $0x60] sm:$0xff]  ;;  %v1260_v42 = vld [vmem:[%s1743_s1 + $0xb0] sm:$0xff]  ;;  %1784 = vst [vmem:[#allocation10_spill] sm:$0xff] %v1265_v43  ;;  %v1284_v46 = vld [vmem:[%s1743_s1 + $0x78] sm:$0xff] }
  0x1e   :  { %223 = vmax.xlane.f32.xlu1 %v1098_v15  ;;  %221 = vmax.xlane.f32.xlu0 %v1103_v16  ;;  %1783 = vst [vmem:[#allocation9_spill] sm:$0xff] %v1260_v42  ;;  %v1272_v44 = vld [vmem:[%s1743_s1 + $0xc0] sm:$0xff]  ;;  %v1277_v45 = vld [vmem:[%s1743_s1 + $0x70] sm:$0xff]  ;;  %1787 = vst [vmem:[#allocation13_spill] sm:$0xff] %v1284_v46 }
  0x1f   :  { %1785 = vst [vmem:[#allocation11_spill] sm:$0xff] %v1272_v44  ;;  %1786 = vst [vmem:[#allocation12_spill] sm:$0xff] %v1277_v45  ;;  %v1290_v47 = vld [vmem:[%s1743_s1 + $0x88] sm:$0xff]  ;;  %v1296_v48 = vld [vmem:[%s1743_s1 + $0x98] sm:$0xff] }
  0x20   :  { %1788 = vst [vmem:[#allocation14_spill] sm:$0xff] %v1290_v47  ;;  %1789 = vst [vmem:[#allocation15_spill] sm:$0xff] %v1296_v48  ;;  %v1302_v49 = vld [vmem:[%s1743_s1 + $0xa8] sm:$0xff]  ;;  %v1308_v50 = vld [vmem:[%s1743_s1 + $0xb8] sm:$0xff]  ;;  %s987_s1 = smov [#allocation2]  }
  0x21   :  { %1790 = vst [vmem:[#allocation16_spill] sm:$0xff] %v1302_v49  ;;  %1791 = vst [vmem:[#allocation17_spill] sm:$0xff] %v1308_v50  ;;  %s807_s29 = sshll.u32 %s987_s1, 4  ;;  %s808_s29 = int_to_ptr.vmem [resolvable:$true] %s807_s29 }
  0x22   :  { %227 = vmax.xlane.f32.xlu1 %v1110_v17  ;;  %225 = vmax.xlane.f32.xlu0 %v1115_v18  ;;  %s938_s7 = scalar_lea.vmem %s808_s29, 128  ;;  %p943_p1 = scmp.lt.s32.totalorder %s808_s29, %s808_s29 }
  0x23   :  { %p939_p0 = scmp.ne.s32.totalorder %s808_s29, %s938_s7  ;;  %p944_p2 = scmp.lt.s32.totalorder %s938_s7, %s938_s7 }
  0x25   :  { %p945_p3 = por %p944_p2, %p943_p1 }
  0x26   :  { %229 = vmax.xlane.f32.xlu1 %v1122_v19  ;;  %231 = vmax.xlane.f32.xlu0 %v1127_v20 }
  0x27   :  { %p946_p4 = pnand %p945_p3, %p939_p0 }
  0x2a   :  { %233 = vmax.xlane.f32.xlu1 %v1134_v21  ;;  %235 = vmax.xlane.f32.xlu0 %v1139_v22 }
  0x2e   :  { %237 = vmax.xlane.f32.xlu1 %v1146_v23  ;;  %239 = vmax.xlane.f32.xlu0 %v1151_v24 }
  0x32   :  { %241 = vmax.xlane.f32.xlu1 %v1158_v25 }
  0x43   :  { %374 = vperm.xlu1 %837, %v1164_v26  }
  0x44   :  { %371 = vperm.xlu0 %836, %v1169_v27  }
  0x47   :  { %380 = vperm.xlu1 %837, %v1176_v28  }
  0x48   :  { %377 = vperm.xlu0 %836, %v1181_v29  }
  0x4b   :  { %386 = vperm.xlu1 %837, %v1188_v30  }
  0x4c   :  { %383 = vperm.xlu0 %836, %v1193_v31  }
  0x4f   :  { %392 = vperm.xlu1 %837, %v1200_v32  }
  0x50   :  { %389 = vperm.xlu0 %836, %v1205_v33  }
  0x53   :  { %404 = vperm.xlu1 %837, %v1212_v34  }
  0x54   :  { %395 = vperm.xlu0 %836, %v1217_v35  }
  0x57   :  { %419 = vperm.xlu1 %837, %v1224_v36  }
  0x58   :  { %398 = vperm.xlu0 %836, %v1229_v37  }
  0x5b   :  { %425 = vperm.xlu1 %837, %v1236_v38  }
  0x5c   :  { %401 = vperm.xlu0 %836, %v1241_v39  }
  0x5f   :  { %431 = vperm.xlu1 %837, %v1248_v40  }
  0x60   :  { %407 = vperm.xlu0 %836, %v1253_v41  }
  0x63   :  { %437 = vperm.xlu1 %837, %v1260_v42  }
  0x64   :  { %410 = vperm.xlu0 %836, %v1265_v43  }
  0x67   :  { %443 = vperm.xlu1 %837, %v1272_v44  }
  0x68   :  { %413 = vperm.xlu0 %836, %v1277_v45  }
  0x6c   :  { %416 = vperm.xlu0 %836, %v1284_v46  }
  0x70   :  { %422 = vperm.xlu0 %836, %v1290_v47   ;;  %v368_v47 = vlaneseq }
  0x72   :  { %v1374_v46 = vand.u32 127, %v368_v47 }
  0x74   :  { %428 = vperm.xlu0 %836, %v1296_v48  }
  0x78   :  { %434 = vperm.xlu0 %836, %v1302_v49  }
  0x7c   :  { %440 = vperm.xlu0 %836, %v1308_v50  }
  0x8f   :  { %v198_v51 = vpop.xlane.xlu1 %197  ;;  %v194_v52 = vpop.xlane.xlu0 %193 }
  0x90   :  { %v1312_v53 = vsub.f32 %v1012_v0, %v198_v51  ;;  %v1315_v54 = vsub.f32 %v1017_v1, %v194_v52 }
  0x92   :  { %v268_v55 = vmul.f32 1.442695, %v1315_v54  ;;  %v272_v58 = vmul.f32 1.442695, %v1312_v53 }
  0x93   :  { %v200_v56 = vpop.xlane.xlu1 %199  ;;  %v196_v57 = vpop.xlane.xlu0 %195 }
  0x94   :  { %v1320_v59 = vsub.f32 %v1024_v2, %v200_v56  ;;  %v1323_v60 = vsub.f32 %v1029_v3, %v196_v57  ;;  %838 = vpow2.f32 %v268_v55 }
  0x95   :  { %840 = vpow2.f32 %v272_v58 }
  0x96   :  { %v270_v61 = vmul.f32 1.442695, %v1323_v60  ;;  %v274_v0 = vmul.f32 1.442695, %v1320_v59 }
  0x97   :  { %v204_v62 = vpop.xlane.xlu1 %203  ;;  %v202_v63 = vpop.xlane.xlu0 %201 }
  0x98   :  { %v1328_v1 = vsub.f32 %v1038_v5, %v204_v62  ;;  %v1331_v51 = vsub.f32 %v1043_v6, %v202_v63  ;;  %842 = vpow2.f32 %v270_v61 }
  0x99   :  { %844 = vpow2.f32 %v274_v0 }
  0x9a   :  { %v276_v2 = vmul.f32 1.442695, %v1331_v51  ;;  %v278_v55 = vmul.f32 1.442695, %v1328_v1 }
  0x9b   :  { %v208_v52 = vpop.xlane.xlu1 %207  ;;  %v206_v3 = vpop.xlane.xlu0 %205 }
  0x9c   :  { %v1336_v56 = vsub.f32 %v1055_v8, %v206_v3  ;;  %846 = vpow2.f32 %v276_v2  ;;  %v1339_v57 = vsub.f32 %v1050_v7, %v208_v52 }
  0x9d   :  { %848 = vpow2.f32 %v278_v55 }
  0x9e   :  { %v280_v5 = vmul.f32 1.442695, %v1336_v56  ;;  %v839_v58 = vpop.eup %838  ;;  %v282_v61 = vmul.f32 1.442695, %v1339_v57 }
  0x9f   :  { %v212_v6 = vpop.xlane.xlu1 %211  ;;  %v210_v62 = vpop.xlane.xlu0 %209  ;;  %318 = vadd.xlane.f32.xlu0 %v839_v58 }
  0xa0   :  { %850 = vpow2.f32 %v280_v5  ;;  %v841_v63 = vpop.eup %840 }
  0xa1   :  { %852 = vpow2.f32 %v282_v61 }
  0xa2   :  { %v843_v0 = vpop.eup %842 }
  0xa3   :  { %v216_v4 = vpop.xlane.xlu1 %215  ;;  %v214_v42 = vpop.xlane.xlu0 %213  ;;  %322 = vadd.xlane.f32.xlu0 %v841_v63  ;;  %320 = vadd.xlane.f32.xlu1 %v843_v0  ;;  %v1354_v0 = vsub.f32 %v1067_v10, %v210_v62 }
  0xa4   :  { %v845_v8 = vpop.eup %844  ;;  %v1368_v45 = vsub.f32 %v1079_v12, %v214_v42 }
  0xa6   :  { %v847_v7 = vpop.eup %846 }
  0xa7   :  { %v220_v2 = vpop.xlane.xlu1 %219  ;;  %v218_v52 = vpop.xlane.xlu0 %217  ;;  %324 = vadd.xlane.f32.xlu0 %v845_v8  ;;  %326 = vadd.xlane.f32.xlu1 %v847_v7 }
  0xa8   :  { %v849_v3 = vpop.eup %848 }
  0xaa   :  { %v851_v50 = vpop.eup %850 }
  0xab   :  { %v1343_v55 = vpop.xlane.xlu1 %223  ;;  %v222_v58 = vpop.xlane.xlu0 %221  ;;  %328 = vadd.xlane.f32.xlu0 %v849_v3  ;;  %330 = vadd.xlane.f32.xlu1 %v851_v50  ;;  %v1361_v3 = vsub.f32 %v1062_v9, %v212_v6  ;;  %v284_v50 = vmul.f32 1.442695, %v1354_v0  ;;  %v1377_v9 = vsub.f32 %v1074_v11, %v216_v4  ;;  %v288_v6 = vmul.f32 1.442695, %v1368_v45 }
  0xac   :  { %v853_v5 = vpop.eup %852  ;;  %v1386_v4 = vsub.f32 %v1091_v14, %v218_v52 }
  0xad   :  { %854 = vpow2.f32 %v284_v50  ;;  %v290_v47 = vmul.f32 1.442695, %v1377_v9 }
  0xaf   :  { %v1345_v49 = vpop.xlane.xlu1 %227  ;;  %v1347_v44 = vpop.xlane.xlu0 %225  ;;  %332 = vadd.xlane.f32.xlu0 %v853_v5  ;;  %v286_v5 = vmul.f32 1.442695, %v1361_v3 }
  0xb1   :  { %856 = vpow2.f32 %v286_v5 }
  0xb2   :  { %858 = vpow2.f32 %v288_v6  ;;  %v1399_v6 = vsub.f32 %v1103_v16, %v222_v58  ;;  %v1413_v58 = vsub.f32 %v1115_v18, %v1347_v44 }
  0xb3   :  { %v1349_v61 = vpop.xlane.xlu1 %229  ;;  %v1351_v63 = vpop.xlane.xlu0 %231  ;;  %860 = vpow2.f32 %v290_v47 }
  0xb4   :  { %v296_v47 = vmul.f32 1.442695, %v1399_v6 }
  0xb7   :  { %v1356_v8 = vpop.xlane.xlu1 %233  ;;  %v1358_v7 = vpop.xlane.xlu0 %235 }
  0xb8   :  { %v855_v5 = vpop.eup %854 }
  0xbb   :  { %v1364_v48 = vpop.xlane.xlu1 %237  ;;  %v1370_v10 = vpop.xlane.xlu0 %239 }
  0xbc   :  { %v857_v14 = vpop.eup %856 }
  0xbf   :  { %v1372_v62 = vpop.xlane.xlu1 %241 }
  0xc3   :  { %v375_v38 = vpop.permute.xlu1 %374  ;;  %v372_v43 = vpop.permute.xlu0 %371 }
  0xc4   :  { %vm446_vm0 = vcmp.eq.s32.totalorder %v1374_v46, %v375_v38  ;;  %vm445_vm1 = vcmp.eq.s32.totalorder %v1374_v46, %v372_v43  ;;  %v1392_v43 = vsub.f32 %v1086_v13, %v220_v2  ;;  %v859_v13 = vpop.eup %858 }
  0xc5   :  { %v471_v12 = vsel %vm446_vm0, %v1323_v60, 0.0  ;;  %v470_v42 = vsel %vm445_vm1, %v1315_v54, 0.0  ;;  %v292_v54 = vmul.f32 1.442695, %v1386_v4  ;;  %vm118_vm0 = vcmp.ne.s32.totalorder %v1169_v27, 4294967295 }
  0xc6   :  { %497 = vadd.xlane.f32.xlu0 %v471_v12  ;;  %495 = vadd.xlane.f32.xlu1 %v470_v42 }
  0xc7   :  { %v381_v11 = vpop.permute.xlu1 %380  ;;  %v378_v50 = vpop.permute.xlu0 %377  ;;  %862 = vpow2.f32 %v292_v54  ;;  %v300_v54 = vmul.f32 1.442695, %v1413_v58 }
  0xc8   :  { %vm447_vm2 = vcmp.eq.s32.totalorder %v1374_v46, %v378_v50  ;;  %vm448_vm3 = vcmp.eq.s32.totalorder %v1374_v46, %v381_v11  ;;  %v861_v50 = vpop.eup %860 }
  0xc9   :  { %v472_v38 = vsel %vm447_vm2, %v1312_v53, 0.0  ;;  %v473_v52 = vsel %vm448_vm3, %v1320_v59, 0.0  ;;  %v294_v53 = vmul.f32 1.442695, %v1392_v43  ;;  %v1405_v59 = vsub.f32 %v1098_v15, %v1343_v55 }
  0xca   :  { %334 = vadd.xlane.f32.xlu1 %v855_v5  ;;  %499 = vadd.xlane.f32.xlu0 %v472_v38  ;;  %vm121_vm2 = vcmp.ne.s32.totalorder %v1176_v28, 4294967295  ;;  %vm120_vm3 = vcmp.ne.s32.totalorder %v1181_v29, 4294967295 }
  0xcb   :  { %v384_v60 = vpop.permute.xlu0 %383  ;;  %v387_v12 = vpop.permute.xlu1 %386  ;;  %864 = vpow2.f32 %v294_v53 }
  0xcc   :  { %vm449_vm4 = vcmp.eq.s32.totalorder %v1374_v46, %v384_v60  ;;  %vm450_vm5 = vcmp.eq.s32.totalorder %v1374_v46, %v387_v12  ;;  %866 = vpow2.f32 %v296_v47 }
  0xcd   :  { %v474_v2 = vsel %vm449_vm4, %v1331_v51, 0.0  ;;  %v475_v16 = vsel %vm450_vm5, %v1328_v1, 0.0  ;;  %v298_v51 = vmul.f32 1.442695, %v1405_v59  ;;  %v1419_v1 = vsub.f32 %v1110_v17, %v1345_v49 }
  0xce   :  { %336 = vadd.xlane.f32.xlu1 %v857_v14  ;;  %501 = vadd.xlane.f32.xlu0 %v473_v52  ;;  %vm122_vm4 = vcmp.ne.s32.totalorder %v1193_v31, 4294967295  ;;  %vm1780_vm5 = vcmp.ne.s32.totalorder %v1200_v32, 4294967295 }
  0xcf   :  { %v390_v42 = vpop.permute.xlu0 %389  ;;  %v393_v5 = vpop.permute.xlu1 %392  ;;  %868 = vpow2.f32 %v298_v51  ;;  %v302_v44 = vmul.f32 1.442695, %v1419_v1  ;;  %v1477_v51 = vsub.f32 %v1158_v25, %v1372_v62 }
  0xd0   :  { %vm451_vm6 = vcmp.eq.s32.totalorder %v1374_v46, %v390_v42  ;;  %vm452_vm7 = vcmp.eq.s32.totalorder %v1374_v46, %v393_v5  ;;  %870 = vpow2.f32 %v300_v54 }
  0xd1   :  { %v863_v15 = vpop.eup %862  ;;  %v476_v38 = vsel %vm451_vm6, %v1336_v56, 0.0  ;;  %v477_v18 = vsel %vm452_vm7, %v1339_v57, 0.0  ;;  %v1427_v56 = vsub.f32 %v1122_v19, %v1349_v61  ;;  %872 = vpow2.f32 %v302_v44 }
  0xd2   :  { %338 = vadd.xlane.f32.xlu1 %v859_v13  ;;  %503 = vadd.xlane.f32.xlu0 %v474_v2  ;;  %v1434_v57 = vsub.f32 %v1127_v20, %v1351_v63  ;;  %vm123_vm7 = vcmp.ne.s32.totalorder %v1188_v30, 4294967295 }
  0xd3   :  { %v396_v11 = vpop.permute.xlu0 %395  ;;  %v304_v49 = vmul.f32 1.442695, %v1427_v56  ;;  %v405_v42 = vpop.permute.xlu1 %404 }
  0xd4   :  { %vm453_vm8 = vcmp.eq.s32.totalorder %v1374_v46, %v396_v11  ;;  %v306_v61 = vmul.f32 1.442695, %v1434_v57  ;;  %vm456_vm11 = vcmp.eq.s32.totalorder %v1374_v46, %v405_v42 }
  0xd5   :  { %v865_v60 = vpop.eup %864  ;;  %v478_v17 = vsel %vm453_vm8, %v1354_v0, 0.0  ;;  %874 = vpow2.f32 %v304_v49  ;;  %v1441_v0 = vsub.f32 %v1134_v21, %v1356_v8  ;;  %v481_v21 = vsel %vm456_vm11, %v1377_v9, 0.0 }
  0xd6   :  { %340 = vadd.xlane.f32.xlu1 %v861_v50  ;;  %505 = vadd.xlane.f32.xlu0 %v475_v16  ;;  %v867_v52 = vpop.eup %866  ;;  %876 = vpow2.f32 %v306_v61  ;;  %v1455_v8 = vsub.f32 %v1146_v23, %v1364_v48  ;;  %v1462_v9 = vsub.f32 %v1151_v24, %v1370_v10  ;;  %v1792_v23 = vmov 0  }
  0xd7   :  { %v399_v55 = vpop.permute.xlu0 %398  ;;  %v308_v63 = vmul.f32 1.442695, %v1441_v0  ;;  %v705_v48 = vsel %vm119_vm14, 1, %v1792_v23  ;;  %v704_v24 = vsel %vm118_vm0, 1, %v1792_v23  ;;  %v420_v5 = vpop.permute.xlu1 %419  ;;  %v706_v54 = vsel %vm120_vm3, 1, %v1792_v23 }
  0xd8   :  { %vm454_vm9 = vcmp.eq.s32.totalorder %v1374_v46, %v399_v55  ;;  %v314_v10 = vmul.f32 1.442695, %v1462_v9  ;;  %v729_v62 = vsel %vm645_vm15, %v704_v24, 0  ;;  %vm124_vm8 = vcmp.ne.s32.totalorder %v1205_v33, 4294967295 }
  0xd9   :  { %v869_v53 = vpop.eup %868  ;;  %v479_v19 = vsel %vm454_vm9, %v1361_v3, 0.0  ;;  %v1448_v3 = vsub.f32 %v1139_v22, %v1358_v7  ;;  %878 = vpow2.f32 %v308_v63  ;;  %v312_v7 = vmul.f32 1.442695, %v1455_v8 }
  0xda   :  { %342 = vadd.xlane.f32.xlu1 %v863_v15  ;;  %507 = vadd.xlane.f32.xlu0 %v476_v38  ;;  %v871_v13 = vpop.eup %870  ;;  %v730_v15 = vsel %vm645_vm15, %v705_v48, 0  ;;  %v707_v38 = vsel %vm121_vm2, 1, %v1792_v23  ;;  %vm1776_vm9 = vcmp.ne.s32.totalorder %v1217_v35, 4294967295  ;;  %vm461_vm11 = vcmp.eq.s32.totalorder %v1374_v46, %v420_v5 }
  0xdb   :  { %v402_v14 = vpop.permute.xlu0 %401  ;;  %v873_v47 = vpop.eup %872  ;;  %v732_v44 = vsel %vm645_vm15, %v707_v38, 0 }
  0xdc   :  { %vm455_vm10 = vcmp.eq.s32.totalorder %v1374_v46, %v402_v14  ;;  %v731_v14 = vsel %vm645_vm15, %v706_v54, 0  ;;  %v1793_v54 = vld [vmem:[#allocation10_spill] sm:$0xff] }
  0xdd   :  { %v480_v20 = vsel %vm455_vm10, %v1368_v45, 0.0  ;;  %v310_v45 = vmul.f32 1.442695, %v1448_v3  ;;  %vm1768_vm10 = vcmp.ne.s32.totalorder %v1212_v34, 4294967295 }
  0xde   :  { %344 = vadd.xlane.f32.xlu1 %v865_v60  ;;  %509 = vadd.xlane.f32.xlu0 %v477_v18  ;;  %v708_v60 = vsel %vm122_vm4, 1, %v1792_v23  ;;  %v711_v18 = vsel %vm1780_vm5, 1, %v1792_v23  ;;  %v715_v63 = vsel %vm1768_vm10, 1, %v1792_v23  ;;  %vm1771_vm10 = vcmp.ne.s32.totalorder %v1241_v39, 4294967295 }
  0xdf   :  { %v408_v12 = vpop.permute.xlu0 %407  ;;  %v875_v11 = vpop.eup %874  ;;  %880 = vpow2.f32 %v310_v45  ;;  %v733_v49 = vsel %vm645_vm15, %v708_v60, 0  ;;  %v739_v42 = vsel %vm645_vm15, %v711_v18, 0 }
  0xe0   :  { %vm457_vm12 = vcmp.eq.s32.totalorder %v1374_v46, %v408_v12  ;;  %v877_v16 = vpop.eup %876  ;;  %882 = vpow2.f32 %v312_v7  ;;  %v426_v12 = vpop.permute.xlu1 %425  ;;  %v740_v45 = vadd.s32 %v739_v42, %v732_v44  ;;  %v747_v7 = vsel %vm645_vm15, %v715_v63, 0  ;;  %v1798_v42 = vld [vmem:[#allocation15_spill] sm:$0xff] }
  0xe1   :  { %v482_v22 = vsel %vm457_vm12, %v1386_v4, 0.0  ;;  %884 = vpow2.f32 %v314_v10  ;;  %vm1772_vm12 = vcmp.ne.s32.totalorder %v1229_v37, 4294967295 }
  0xe2   :  { %346 = vadd.xlane.f32.xlu1 %v867_v52  ;;  %511 = vadd.xlane.f32.xlu0 %v478_v17  ;;  %v709_v52 = vsel %vm123_vm7, 1, %v1792_v23 }
  0xe3   :  { %v411_v2 = vpop.permute.xlu0 %410  ;;  %v879_v55 = vpop.eup %878 }
  0xe4   :  { %vm458_vm13 = vcmp.eq.s32.totalorder %v1374_v46, %v411_v2 }
  0xe5   :  { %v483_v4 = vsel %vm458_vm13, %v1392_v43, 0.0  ;;  %vm1769_vm13 = vcmp.ne.s32.totalorder %v1224_v36, 4294967295 }
  0xe6   :  { %348 = vadd.xlane.f32.xlu1 %v869_v53  ;;  %513 = vadd.xlane.f32.xlu0 %v479_v19  ;;  %v710_v53 = vsel %vm124_vm8, 1, %v1792_v23  ;;  %v720_v48 = vsel %vm1769_vm13, 1, %v1792_v23  ;;  %vm1773_vm13 = vcmp.ne.s32.totalorder %v1793_v54, 4294967295 }
  0xe7   :  { %v414_v50 = vpop.permute.xlu0 %413  ;;  %v737_v2 = vsel %vm645_vm15, %v710_v53, 0  ;;  %v717_v18 = vsel %vm1773_vm13, 1, %v1792_v23  ;;  %v1797_v53 = vld [vmem:[#allocation14_spill] sm:$0xff] }
  0xe8   :  { %vm459_vm1 = vcmp.eq.s32.totalorder %v1374_v46, %v414_v50  ;;  %v486_v50 = vsel %vm461_vm11, %v1413_v58, 0.0  ;;  %v432_v58 = vpop.permute.xlu1 %431  ;;  %v738_v10 = vadd.s32 %v737_v2, %v731_v14  ;;  %vm1774_vm11 = vcmp.ne.s32.totalorder %v1248_v40, 4294967295 }
  0xe9   :  { %v484_v25 = vsel %vm459_vm1, %v1399_v6, 0.0  ;;  %v316_v6 = vmul.f32 1.442695, %v1477_v51  ;;  %v881_v17 = vpop.eup %880  ;;  %vm1770_vm1 = vcmp.ne.s32.totalorder %v1253_v41, 4294967295  ;;  %v724_v14 = vsel %vm1774_vm11, 1, %v1792_v23 }
  0xea   :  { %350 = vadd.xlane.f32.xlu1 %v871_v13  ;;  %515 = vadd.xlane.f32.xlu0 %v480_v20  ;;  %v712_v13 = vsel %vm1776_vm9, 1, %v1792_v23  ;;  %v735_v20 = vsel %vm645_vm15, %v709_v52, 0  ;;  %vm1779_vm13 = vcmp.ne.s32.totalorder %v1797_v53, 4294967295  ;;  %vm1781_vm11 = vcmp.ne.s32.totalorder %v1798_v42, 4294967295 }
  0xeb   :  { %v417_v43 = vpop.permute.xlu0 %416  ;;  %886 = vpow2.f32 %v316_v6  ;;  %v1794_v6 = vld [vmem:[#allocation8_spill] sm:$0xff]  ;;  %v765_v2 = vsel %vm645_vm15, %v724_v14, 0 }
  0xec   :  { %vm460_vm6 = vcmp.eq.s32.totalorder %v1374_v46, %v417_v43  ;;  %v714_v43 = vsel %vm1771_vm10, 1, %v1792_v23  ;;  %vm1778_vm10 = vcmp.ne.s32.totalorder %v1794_v6, 4294967295 }
  0xed   :  { %v485_v61 = vsel %vm460_vm6, %v1405_v59, 0.0  ;;  %v734_v59 = vadd.s32 %v733_v49, %v729_v62  ;;  %v757_v62 = vsel %vm645_vm15, %v720_v48, 0  ;;  %v745_v44 = vsel %vm645_vm15, %v714_v43, 0  ;;  %v1801_v48 = vld [vmem:[#allocation17_spill] sm:$0xff] }
  0xee   :  { %352 = vadd.xlane.f32.xlu1 %v873_v47  ;;  %517 = vadd.xlane.f32.xlu0 %v481_v21  ;;  %v713_v47 = vsel %vm1772_vm12, 1, %v1792_v23  ;;  %v883_v21 = vpop.eup %882  ;;  %v1802_v43 = vld [vmem:[#allocation9_spill] sm:$0xff] }
  0xef   :  { %v423_v19 = vpop.permute.xlu0 %422 }
  0xf0   :  { %vm462_vm6 = vcmp.eq.s32.totalorder %v1374_v46, %v423_v19  ;;  %v751_v19 = vsel %vm645_vm15, %v717_v18, 0 }
  0xf2   :  { %354 = vadd.xlane.f32.xlu1 %v875_v11  ;;  %519 = vadd.xlane.f32.xlu0 %v482_v22  ;;  %v741_v11 = vsel %vm645_vm15, %v712_v13, 0  ;;  %v736_v22 = vadd.s32 %v735_v20, %v730_v15  ;;  %v885_v15 = vpop.eup %884  ;;  %v438_v20 = vpop.permute.xlu1 %437 }
  0xf3   :  { %v429_v24 = vpop.permute.xlu0 %428  ;;  %v742_v5 = vadd.s32 %v741_v11, %v734_v59  ;;  %v722_v59 = vsel %vm1778_vm10, 1, %v1792_v23  ;;  %vm141_vm10 = vcmp.ne.s32.totalorder %v1801_v48, 4294967295 }
  0xf4   :  { %vm464_vm9 = vcmp.eq.s32.totalorder %v1374_v46, %v429_v24 }
  0xf6   :  { %356 = vadd.xlane.f32.xlu1 %v877_v16  ;;  %521 = vadd.xlane.f32.xlu0 %v483_v4  ;;  %v716_v16 = vsel %vm1770_vm1, 1, %v1792_v23  ;;  %v743_v4 = vsel %vm645_vm15, %v713_v47, 0  ;;  %vm463_vm1 = vcmp.eq.s32.totalorder %v1374_v46, %v426_v12  ;;  %v887_v12 = vpop.eup %886  ;;  %v746_v47 = vadd.s32 %v745_v44, %v738_v10 }
  0xf7   :  { %v749_v38 = vsel %vm645_vm15, %v716_v16, 0  ;;  %v744_v60 = vadd.s32 %v743_v4, %v736_v22  ;;  %v488_v13 = vsel %vm463_vm1, %v1427_v56, 0.0  ;;  %v435_v63 = vpop.permute.xlu0 %434  ;;  %v721_v56 = vsel %vm1779_vm13, 1, %v1792_v23  ;;  %v1800_v16 = vld [vmem:[#allocation16_spill] sm:$0xff] }
  0xf8   :  { %v750_v52 = vadd.s32 %v749_v38, %v742_v5  ;;  %vm139_vm1 = vcmp.ne.s32.totalorder %v1800_v16, 4294967295  ;;  %v759_v10 = vsel %vm645_vm15, %v721_v56, 0  ;;  %vm467_vm13 = vcmp.eq.s32.totalorder %v1374_v46, %v438_v20  ;;  %v444_v38 = vpop.permute.xlu1 %443 }
  0xf9   :  { %vm466_vm5 = vcmp.eq.s32.totalorder %v1374_v46, %v435_v63  ;;  %v761_v5 = vsel %vm645_vm15, %v722_v59, 0  ;;  %v492_v44 = vsel %vm467_vm13, %v1455_v8, 0.0 }
  0xfa   :  { %358 = vadd.xlane.f32.xlu1 %v879_v55  ;;  %523 = vadd.xlane.f32.xlu0 %v484_v25  ;;  %v748_v55 = vadd.s32 %v747_v7, %v740_v45  ;;  %v487_v25 = vsel %vm462_vm6, %v1419_v1, 0.0  ;;  %v1795_v1 = vld [vmem:[#allocation13_spill] sm:$0xff]  ;;  %v758_v11 = vadd.s32 %v757_v62, %v750_v52  ;;  %v723_v7 = vsel %vm1781_vm11, 1, %v1792_v23 }
  0xfb   :  { %vm1775_vm6 = vcmp.ne.s32.totalorder %v1795_v1, 4294967295  ;;  %vm140_vm11 = vcmp.ne.s32.totalorder %v1802_v43, 4294967295  ;;  %v727_v62 = vsel %vm141_vm10, 1, %v1792_v23  ;;  %v491_v14 = vsel %vm466_vm5, %v1448_v3, 0.0 }
  0xfc   :  { %v719_v49 = vsel %vm1775_vm6, 1, %v1792_v23  ;;  %vm465_vm6 = vcmp.eq.s32.totalorder %v1374_v46, %v432_v58  ;;  %v489_v58 = vsel %vm464_vm9, %v1434_v57, 0.0  ;;  %v726_v52 = vsel %vm140_vm11, 1, %v1792_v23 }
  0xfd   :  { %v755_v45 = vsel %vm645_vm15, %v719_v49, 0  ;;  %v490_v4 = vsel %vm465_vm6, %v1441_v0, 0.0  ;;  %vm469_vm9 = vcmp.eq.s32.totalorder %v1374_v46, %v444_v38  ;;  %v769_v3 = vsel %vm645_vm15, %v726_v52, 0 }
  0xfe   :  { %360 = vadd.xlane.f32.xlu1 %v881_v17  ;;  %525 = vadd.xlane.f32.xlu0 %v485_v61  ;;  %v1796_v17 = vld [vmem:[#allocation12_spill] sm:$0xff]  ;;  %v756_v24 = vadd.s32 %v755_v45, %v748_v55  ;;  %v725_v55 = vsel %vm139_vm1, 1, %v1792_v23  ;;  %vm1808_vm5 = vcmp.ne.s32.totalorder %v1253_v41, 4294967295  ;;  %vm1811_vm13 = vcmp.ne.s32.totalorder %v1795_v1, 4294967295 }
  0xff   :  { %vm1777_vm12 = vcmp.ne.s32.totalorder %v1796_v17, 4294967295 }
 0x100   :  { %v718_v61 = vsel %vm1777_vm12, 1, %v1792_v23 }
 0x101   :  { %v753_v22 = vsel %vm645_vm15, %v718_v61, 0  ;;  %v771_v61 = vsel %vm645_vm15, %v727_v62, 0 }
 0x102   :  { %362 = vadd.xlane.f32.xlu1 %v883_v21  ;;  %527 = vadd.xlane.f32.xlu0 %v486_v50  ;;  %v1799_v21 = vld [vmem:[#allocation11_spill] sm:$0xff]  ;;  %v752_v50 = vadd.s32 %v751_v19, %v744_v60  ;;  %v754_v0 = vadd.s32 %v753_v22, %v746_v47  ;;  %v766_v60 = vadd.s32 %v765_v2, %v758_v11  ;;  %v767_v19 = vsel %vm645_vm15, %v725_v55, 0 }
 0x103   :  { %vm142_vm12 = vcmp.ne.s32.totalorder %v1799_v21, 4294967295 }
 0x104   :  { %v728_v57 = vsel %vm142_vm12, 1, %v1792_v23  ;;  %v760_v18 = vadd.s32 %v759_v10, %v752_v50  ;;  %v762_v8 = vadd.s32 %v761_v5, %v754_v0 }
 0x106   :  { %364 = vadd.xlane.f32.xlu1 %v885_v15  ;;  %529 = vadd.xlane.f32.xlu0 %v487_v25  ;;  %v763_v15 = vsel %vm645_vm15, %v723_v7, 0  ;;  %v441_v25 = vpop.permute.xlu0 %440  ;;  %v768_v63 = vadd.s32 %v767_v19, %v760_v18 }
 0x107   :  { %v764_v49 = vadd.s32 %v763_v15, %v756_v24  ;;  %vm468_vm6 = vcmp.eq.s32.totalorder %v1374_v46, %v441_v25  ;;  %v770_v46 = vadd.s32 %v769_v3, %v762_v8 }
 0x108   :  { %v493_v23 = vsel %vm468_vm6, %v1462_v9, 0.0  ;;  %vm1813_vm6 = vcmp.ne.s32.totalorder %v1797_v53, 4294967295 }
 0x109   :  { %v772_v59 = vadd.s32 %v771_v61, %v764_v49 }
 0x10a   :  { %366 = vadd.xlane.f32.xlu1 %v887_v12  ;;  %531 = vadd.xlane.f32.xlu0 %v488_v13  ;;  %v773_v12 = vsel %vm645_vm15, %v728_v57, 0  ;;  %v494_v13 = vsel %vm469_vm9, %v1477_v51, 0.0  ;;  %vm1812_vm9 = vcmp.ne.s32.totalorder %v1224_v36, 4294967295 }
 0x10b   :  { %v774_v20 = vadd.s32 %v773_v12, %v766_v60  ;;  %v776_v47 = vadd.s32 %v772_v59, %v770_v46 }
 0x10d   :  { %v775_v2 = vadd.s32 %v774_v20, %v768_v63 }
 0x10e   :  { %535 = vadd.xlane.f32.xlu0 %v490_v4  ;;  %533 = vadd.xlane.f32.xlu1 %v489_v58 }
 0x10f   :  { %v777_v45 = vadd.s32 %v776_v47, %v775_v2 }
 0x111   :  { %v779_v56 = vshrl.u32 %v777_v45, 16  ;;  %v778_v50 = vand.u32 65535, %v777_v45 }
 0x112   :  { %539 = vadd.xlane.f32.xlu0 %v492_v44  ;;  %537 = vadd.xlane.f32.xlu1 %v491_v14 }
 0x113   :  { %v781_v11 = vcvt.s32.f32 %v779_v56  ;;  %v780_v22 = vcvt.s32.f32 %v778_v50 }
 0x116   :  { %543 = vadd.xlane.f32.xlu0 %v494_v13  ;;  %541 = vadd.xlane.f32.xlu1 %v493_v23 }
 0x11a   :  { %784 = vadd.xlane.f32.xlu1 %v781_v11  ;;  %782 = vadd.xlane.f32.xlu0 %v780_v22 }
 0x12c   :  { %v319_v7 = vpop.xlane.xlu0 %318 }
 0x12d   :  { %888 = vlog2.f32 %v319_v7 }
 0x130   :  { %v323_v4 = vpop.xlane.xlu0 %322  ;;  %v321_v51 = vpop.xlane.xlu1 %320 }
 0x131   :  { %890 = vlog2.f32 %v321_v51 }
 0x132   :  { %892 = vlog2.f32 %v323_v4 }
 0x134   :  { %v325_v58 = vpop.xlane.xlu0 %324  ;;  %v327_v9 = vpop.xlane.xlu1 %326 }
 0x135   :  { %894 = vlog2.f32 %v325_v58 }
 0x136   :  { %896 = vlog2.f32 %v327_v9 }
 0x137   :  { %v889_v49 = vpop.eup %888 }
 0x138   :  { %v329_v24 = vpop.xlane.xlu0 %328  ;;  %v331_v10 = vpop.xlane.xlu1 %330  ;;  %v546_v3 = vmul.f32 0.6931472, %v889_v49 }
 0x139   :  { %898 = vlog2.f32 %v329_v24 }
 0x13a   :  { %900 = vlog2.f32 %v331_v10 }
 0x13b   :  { %v891_v12 = vpop.eup %890 }
 0x13c   :  { %v333_v5 = vpop.xlane.xlu0 %332  ;;  %v893_v8 = vpop.eup %892  ;;  %v548_v13 = vmul.f32 0.6931472, %v891_v12 }
 0x13d   :  { %902 = vlog2.f32 %v333_v5  ;;  %v550_v2 = vmul.f32 0.6931472, %v893_v8 }
 0x13f   :  { %v895_v23 = vpop.eup %894 }
 0x140   :  { %v897_v47 = vpop.eup %896  ;;  %v552_v56 = vmul.f32 0.6931472, %v895_v23 }
 0x141   :  { %v554_v58 = vmul.f32 0.6931472, %v897_v47 }
 0x143   :  { %v899_v11 = vpop.eup %898 }
 0x144   :  { %v901_v9 = vpop.eup %900  ;;  %v556_v10 = vmul.f32 0.6931472, %v899_v11 }
 0x147   :  { %v903_v5 = vpop.eup %902 }
 0x148   :  { %v560_v12 = vmul.f32 0.6931472, %v903_v5 }
 0x153   :  { %v496_v15 = vpop.xlane.xlu1 %495  ;;  %v498_v38 = vpop.xlane.xlu0 %497 }
 0x154   :  { %v595_v59 = vsub.f32 %v546_v3, %v496_v15  ;;  %v596_v46 = vsub.f32 %v548_v13, %v498_v38 }
 0x156   :  { %v620_v7 = vsel %vm118_vm0, %v595_v59, 0.0  ;;  %v621_v4 = vsel %vm119_vm14, %v596_v46, 0.0  ;;  %vm1803_vm14 = vcmp.ne.s32.totalorder %v1200_v32, 4294967295  ;;  %vm1804_vm0 = vcmp.ne.s32.totalorder %v1217_v35, 4294967295 }
 0x157   :  { %v335_v25 = vpop.xlane.xlu1 %334  ;;  %v500_v57 = vpop.xlane.xlu0 %499  ;;  %v646_v15 = vsel %vm645_vm15, %v620_v7, 0.0  ;;  %v647_v38 = vsel %vm645_vm15, %v621_v4, 0.0 }
 0x158   :  { %904 = vlog2.f32 %v335_v25  ;;  %v597_v45 = vsub.f32 %v550_v2, %v500_v57  ;;  %v648_v49 = vadd.f32 %v647_v38, %v646_v15 }
 0x15a   :  { %v622_v24 = vsel %vm120_vm3, %v597_v45, 0.0  ;;  %vm1806_vm3 = vcmp.ne.s32.totalorder %v1241_v39, 4294967295 }
 0x15b   :  { %v337_v0 = vpop.xlane.xlu1 %336  ;;  %v502_v55 = vpop.xlane.xlu0 %501 }
 0x15c   :  { %906 = vlog2.f32 %v337_v0  ;;  %v598_v51 = vsub.f32 %v552_v56, %v502_v55  ;;  %v649_v0 = vsel %vm645_vm15, %v622_v24, 0.0 }
 0x15d   :  { %v650_v23 = vadd.f32 %v649_v0, %v648_v49 }
 0x15e   :  { %v623_v26 = vsel %vm121_vm2, %v598_v51, 0.0  ;;  %vm1805_vm2 = vcmp.ne.s32.totalorder %v1229_v37, 4294967295 }
 0x15f   :  { %v339_v62 = vpop.xlane.xlu1 %338  ;;  %v504_v60 = vpop.xlane.xlu0 %503  ;;  %v651_v8 = vsel %vm645_vm15, %v623_v26, 0.0 }
 0x160   :  { %908 = vlog2.f32 %v339_v62  ;;  %v599_v25 = vsub.f32 %v554_v58, %v504_v60  ;;  %v558_v62 = vmul.f32 0.6931472, %v901_v9  ;;  %v652_v46 = vadd.f32 %v651_v8, %v650_v23 }
 0x162   :  { %v905_v29 = vpop.eup %904  ;;  %v624_v3 = vsel %vm122_vm4, %v599_v25, 0.0  ;;  %vm1807_vm4 = vcmp.ne.s32.totalorder %v1212_v34, 4294967295 }
 0x163   :  { %v341_v18 = vpop.xlane.xlu1 %340  ;;  %v506_v44 = vpop.xlane.xlu0 %505  ;;  %v562_v59 = vmul.f32 0.6931472, %v905_v29  ;;  %v653_v2 = vsel %vm645_vm15, %v624_v3, 0.0 }
 0x164   :  { %910 = vlog2.f32 %v341_v18  ;;  %v600_v55 = vsub.f32 %v556_v10, %v506_v44  ;;  %v654_v7 = vadd.f32 %v653_v2, %v652_v46 }
 0x166   :  { %v907_v28 = vpop.eup %906  ;;  %v625_v44 = vsel %vm123_vm7, %v600_v55, 0.0  ;;  %vm1809_vm7 = vcmp.ne.s32.totalorder %v1793_v54, 4294967295 }
 0x167   :  { %v343_v14 = vpop.xlane.xlu1 %342  ;;  %v1624_v52 = vpop.xlane.xlu0 %507  ;;  %v655_v30 = vsel %vm645_vm15, %v625_v44, 0.0 }
 0x168   :  { %912 = vlog2.f32 %v343_v14  ;;  %v601_v60 = vsub.f32 %v558_v62, %v1624_v52  ;;  %v656_v58 = vadd.f32 %v655_v30, %v654_v7 }
 0x16a   :  { %v909_v47 = vpop.eup %908  ;;  %v626_v31 = vsel %vm124_vm8, %v601_v60, 0.0  ;;  %vm1810_vm8 = vcmp.ne.s32.totalorder %v1796_v17, 4294967295 }
 0x16b   :  { %v345_v19 = vpop.xlane.xlu1 %344  ;;  %v1626_v61 = vpop.xlane.xlu0 %509  ;;  %v657_v4 = vsel %vm645_vm15, %v626_v31, 0.0  ;;  %v566_v33 = vmul.f32 0.6931472, %v909_v47 }
 0x16c   :  { %914 = vlog2.f32 %v345_v19  ;;  %v602_v14 = vsub.f32 %v560_v12, %v1626_v61  ;;  %v564_v19 = vmul.f32 0.6931472, %v907_v28  ;;  %v658_v32 = vadd.f32 %v657_v4, %v656_v58 }
 0x16e   :  { %v911_v11 = vpop.eup %910  ;;  %v627_v61 = vsel %vm1803_vm14, %v602_v14, 0.0  ;;  %vm1814_vm14 = vcmp.ne.s32.totalorder %v1794_v6, 4294967295 }
 0x16f   :  { %v347_v20 = vpop.xlane.xlu1 %346  ;;  %v1628_v63 = vpop.xlane.xlu0 %511  ;;  %v659_v24 = vsel %vm645_vm15, %v627_v61, 0.0  ;;  %v568_v5 = vmul.f32 0.6931472, %v911_v11 }
 0x170   :  { %916 = vlog2.f32 %v347_v20  ;;  %v603_v52 = vsub.f32 %v562_v59, %v1628_v63  ;;  %v660_v0 = vadd.f32 %v659_v24, %v658_v32 }
 0x172   :  { %v913_v51 = vpop.eup %912  ;;  %v628_v63 = vsel %vm1804_vm0, %v603_v52, 0.0  ;;  %vm1815_vm0 = vcmp.ne.s32.totalorder %v1798_v42, 4294967295 }
 0x173   :  { %v349_v50 = vpop.xlane.xlu1 %348  ;;  %v1630_v22 = vpop.xlane.xlu0 %513  ;;  %v661_v38 = vsel %vm645_vm15, %v628_v63, 0.0 }
 0x174   :  { %918 = vlog2.f32 %v349_v50  ;;  %v604_v20 = vsub.f32 %v564_v19, %v1630_v22  ;;  %v662_v8 = vadd.f32 %v661_v38, %v660_v0 }
 0x176   :  { %v915_v15 = vpop.eup %914  ;;  %v629_v22 = vsel %vm1805_vm2, %v604_v20, 0.0  ;;  %vm1816_vm2 = vcmp.ne.s32.totalorder %v1248_v40, 4294967295 }
 0x177   :  { %v351_v27 = vpop.xlane.xlu1 %350  ;;  %v516_v57 = vpop.xlane.xlu0 %515  ;;  %v663_v62 = vsel %vm645_vm15, %v629_v22, 0.0  ;;  %v572_v49 = vmul.f32 0.6931472, %v915_v15 }
 0x178   :  { %920 = vlog2.f32 %v351_v27  ;;  %v605_v10 = vsub.f32 %v566_v33, %v516_v57  ;;  %v570_v27 = vmul.f32 0.6931472, %v913_v51 }
 0x17a   :  { %v917_v26 = vpop.eup %916  ;;  %v630_v57 = vsel %vm1806_vm3, %v605_v10, 0.0 }
 0x17b   :  { %v353_v18 = vpop.xlane.xlu1 %352  ;;  %v518_v13 = vpop.xlane.xlu0 %517  ;;  %v574_v60 = vmul.f32 0.6931472, %v917_v26  ;;  %v665_v28 = vsel %vm645_vm15, %v630_v57, 0.0 }
 0x17c   :  { %922 = vlog2.f32 %v353_v18  ;;  %v606_v25 = vsub.f32 %v568_v5, %v518_v13  ;;  %v664_v13 = vadd.f32 %v663_v62, %v662_v8 }
 0x17e   :  { %v919_v12 = vpop.eup %918  ;;  %v631_v37 = vsel %vm1807_vm4, %v606_v25, 0.0  ;;  %v666_v2 = vadd.f32 %v665_v28, %v664_v13 }
 0x17f   :  { %v355_v45 = vpop.xlane.xlu1 %354  ;;  %v520_v56 = vpop.xlane.xlu0 %519  ;;  %v576_v59 = vmul.f32 0.6931472, %v919_v12  ;;  %v667_v46 = vsel %vm645_vm15, %v631_v37, 0.0 }
 0x180   :  { %v607_v29 = vsub.f32 %v570_v27, %v520_v56  ;;  %924 = vlog2.f32 %v355_v45  ;;  %v668_v30 = vadd.f32 %v667_v46, %v666_v2 }
 0x182   :  { %v921_v18 = vpop.eup %920  ;;  %v632_v39 = vsel %vm1808_vm5, %v607_v29, 0.0 }
 0x183   :  { %v357_v50 = vpop.xlane.xlu1 %356  ;;  %v522_v9 = vpop.xlane.xlu0 %521  ;;  %v578_v31 = vmul.f32 0.6931472, %v921_v18  ;;  %v669_v19 = vsel %vm645_vm15, %v632_v39, 0.0 }
 0x184   :  { %v608_v3 = vsub.f32 %v572_v49, %v522_v9  ;;  %926 = vlog2.f32 %v357_v50  ;;  %v670_v61 = vadd.f32 %v669_v19, %v668_v30 }
 0x186   :  { %v633_v34 = vsel %vm1809_vm7, %v608_v3, 0.0  ;;  %v923_v52 = vpop.eup %922 }
 0x187   :  { %v359_v35 = vpop.xlane.xlu1 %358  ;;  %v524_v55 = vpop.xlane.xlu0 %523  ;;  %v671_v7 = vsel %vm645_vm15, %v633_v34, 0.0  ;;  %v580_v20 = vmul.f32 0.6931472, %v923_v52 }
 0x188   :  { %v609_v14 = vsub.f32 %v574_v60, %v524_v55  ;;  %928 = vlog2.f32 %v359_v35  ;;  %v672_v63 = vadd.f32 %v671_v7, %v670_v61 }
 0x18a   :  { %v634_v41 = vsel %vm1810_vm8, %v609_v14, 0.0  ;;  %v925_v4 = vpop.eup %924 }
 0x18b   :  { %v361_v23 = vpop.xlane.xlu1 %360  ;;  %v526_v44 = vpop.xlane.xlu0 %525  ;;  %v673_v33 = vsel %vm645_vm15, %v634_v41, 0.0  ;;  %v582_v5 = vmul.f32 0.6931472, %v925_v4 }
 0x18c   :  { %v610_v47 = vsub.f32 %v576_v59, %v526_v44  ;;  %930 = vlog2.f32 %v361_v23  ;;  %v674_v10 = vadd.f32 %v673_v33, %v672_v63 }
 0x18e   :  { %v635_v54 = vsel %vm1811_vm13, %v610_v47, 0.0  ;;  %v927_v24 = vpop.eup %926 }
 0x18f   :  { %v363_v45 = vpop.xlane.xlu1 %362  ;;  %v528_v56 = vpop.xlane.xlu0 %527  ;;  %v675_v9 = vsel %vm645_vm15, %v635_v54, 0.0  ;;  %v584_v55 = vmul.f32 0.6931472, %v927_v24 }
 0x190   :  { %v611_v11 = vsub.f32 %v578_v31, %v528_v56  ;;  %932 = vlog2.f32 %v363_v45  ;;  %v676_v25 = vadd.f32 %v675_v9, %v674_v10 }
 0x192   :  { %v636_v17 = vsel %vm1812_vm9, %v611_v11, 0.0  ;;  %v929_v15 = vpop.eup %928 }
 0x193   :  { %v365_v51 = vpop.xlane.xlu1 %364  ;;  %v530_v58 = vpop.xlane.xlu0 %529  ;;  %v677_v32 = vsel %vm645_vm15, %v636_v17, 0.0  ;;  %v586_v62 = vmul.f32 0.6931472, %v929_v15 }
 0x194   :  { %v612_v50 = vsub.f32 %v580_v20, %v530_v58  ;;  %934 = vlog2.f32 %v365_v51  ;;  %v678_v0 = vadd.f32 %v677_v32, %v676_v25 }
 0x196   :  { %v637_v1 = vsel %vm1813_vm6, %v612_v50, 0.0  ;;  %v931_v26 = vpop.eup %930 }
 0x197   :  { %v367_v22 = vpop.xlane.xlu1 %366  ;;  %v532_v38 = vpop.xlane.xlu0 %531  ;;  %v679_v36 = vsel %vm645_vm15, %v637_v1, 0.0  ;;  %v588_v3 = vmul.f32 0.6931472, %v931_v26 }
 0x198   :  { %936 = vlog2.f32 %v367_v22  ;;  %v613_v27 = vsub.f32 %v582_v5, %v532_v38  ;;  %v680_v12 = vadd.f32 %v679_v36, %v678_v0 }
 0x19a   :  { %v638_v35 = vsel %vm1814_vm14, %v613_v27, 0.0  ;;  %v933_v53 = vpop.eup %932 }
 0x19b   :  { %v681_v57 = vsel %vm645_vm15, %v638_v35, 0.0  ;;  %v534_v29 = vpop.xlane.xlu1 %533  ;;  %v536_v49 = vpop.xlane.xlu0 %535  ;;  %v590_v6 = vmul.f32 0.6931472, %v933_v53 }
 0x19c   :  { %v614_v8 = vsub.f32 %v584_v55, %v534_v29  ;;  %v615_v37 = vsub.f32 %v586_v62, %v536_v49  ;;  %v682_v60 = vadd.f32 %v681_v57, %v680_v12 }
 0x19e   :  { %v639_v18 = vsel %vm1815_vm0, %v614_v8, 0.0  ;;  %v640_v13 = vsel %vm1816_vm2, %v615_v37, 0.0  ;;  %v935_v28 = vpop.eup %934 }
 0x19f   :  { %v683_v23 = vsel %vm645_vm15, %v639_v18, 0.0  ;;  %v538_v44 = vpop.xlane.xlu1 %537  ;;  %v540_v39 = vpop.xlane.xlu0 %539  ;;  %v685_v2 = vsel %vm645_vm15, %v640_v13, 0.0  ;;  %v592_v31 = vmul.f32 0.6931472, %v935_v28 }
 0x1a0   :  { %v684_v14 = vadd.f32 %v683_v23, %v682_v60  ;;  %v616_v59 = vsub.f32 %v588_v3, %v538_v44  ;;  %v617_v46 = vsub.f32 %v590_v6, %v540_v39 }
 0x1a2   :  { %v937_v34 = vpop.eup %936  ;;  %v686_v47 = vadd.f32 %v685_v2, %v684_v14  ;;  %v641_v42 = vsel %vm139_vm1, %v616_v59, 0.0  ;;  %v642_v40 = vsel %vm140_vm11, %v617_v46, 0.0 }
 0x1a3   :  { %v687_v52 = vsel %vm645_vm15, %v641_v42, 0.0  ;;  %v542_v19 = vpop.xlane.xlu1 %541  ;;  %v594_v45 = vmul.f32 0.6931472, %v937_v34  ;;  %v544_v56 = vpop.xlane.xlu0 %543  ;;  %v689_v11 = vsel %vm645_vm15, %v642_v40, 0.0 }
 0x1a4   :  { %v688_v30 = vadd.f32 %v687_v52, %v686_v47  ;;  %v618_v41 = vsub.f32 %v592_v31, %v542_v19 }
 0x1a5   :  { %v619_v7 = vsub.f32 %v594_v45, %v544_v56 }
 0x1a6   :  { %v690_v61 = vadd.f32 %v689_v11, %v688_v30  ;;  %v643_v54 = vsel %vm141_vm10, %v618_v41, 0.0 }
 0x1a7   :  { %v691_v16 = vsel %vm645_vm15, %v643_v54, 0.0  ;;  %v644_v43 = vsel %vm142_vm12, %v619_v7, 0.0  ;;  %v785_v51 = vpop.xlane.xlu1 %784  ;;  %v783_v63 = vpop.xlane.xlu0 %782 }
 0x1a8   :  { %v692_v20 = vadd.f32 %v691_v16, %v690_v61  ;;  %v693_v4 = vsel %vm645_vm15, %v644_v43, 0.0  ;;  %v787_v58 = vcvt.f32.s32 %v785_v51  ;;  %v786_v50 = vcvt.f32.s32 %v783_v63 }
 0x1aa   :  { %v694_v33 = vadd.f32 %v693_v4, %v692_v20  ;;  %v788_v17 = vshll.u32 %v787_v58, 16 }
 0x1ac   :  { %695 = vadd.xlane.f32.xlu1 %v694_v33  ;;  %v789_v9 = vadd.s32 %v788_v17, %v786_v50 }
 0x1ae   :  { %v790_v24 = vrot.slane %v789_v9, 4 }
 0x1b0   :  { %v791_v10 = vadd.s32 %v790_v24, %v789_v9 }
 0x1b2   :  { %v792_v1 = vrot.slane %v791_v10, 2 }
 0x1b4   :  { %v793_v32 = vadd.s32 %v792_v1, %v791_v10 }
 0x1b6   :  { %v794_v38 = vrot.slane %v793_v32, 1 }
 0x1b8   :  { %v795_v36 = vadd.s32 %v794_v38, %v793_v32 }
 0x239   :  { %v696_v48 = vpop.xlane.xlu1 %695 }
 0x23a   :  { %v697_v5 = vrot.slane %v696_v48, 4 }
 0x23c   :  { %v698_v15 = vadd.f32 %v697_v5, %v696_v48 }
 0x23e   :  { %v699_v21 = vrot.slane %v698_v15, 2 }
 0x240   :  { %v700_v22 = vadd.f32 %v699_v21, %v698_v15 }
 0x242   :  { %v701_v25 = vrot.slane %v700_v22, 1 }
 0x244   :  { %v702_v27 = vadd.f32 %v701_v25, %v700_v22 }
 0x246   :  { %829 = vpush %v702_v27 }
 0x247   :  { %831 = vpush %v795_v36 }
 0x277   :  { %s830_s5 = spop %829 }
 0x278   :  { %v797_v26 = vstv %s830_s5  ;;  %s832_s6 = spop %831 }
 0x279   :  { %798 = vst [vmem:[#allocation2] sm:$0xff] %v797_v26  ;;  %v799_v0 = vstv %s832_s6 }
 0x27a   :  { %800 = vst [vmem:[#allocation4] sm:$0xff] %v799_v0 }
 0x27b   :  { %949 = shalt.err (!%p946_p4)
}
 0x27c   :  { %s950_s10 = scalar_lea.hbm %s1744_s2, 128 }
 0x27d   :  { %p951_p5 = scmp.ne.s32.totalorder %s1744_s2, %s950_s10  ;;  %p954_p6 = scmp.lt.u32.totalorder %s950_s10, %s1744_s2 }
 0x27f   :  { %p956_p7 = pnand %p954_p6, %p951_p5 }
 0x281   :  { %959 = shalt.err (!%p956_p7)
}
 0x282   :  { %810 = dma.vmem_to_hbm [thread:$0]  %s808_s29, 128, %s1744_s2, [#allocation3]  }
 0x283   :  { %s960_s16 = scalar_lea.vmem %s1711_s4, 128  ;;  %p965_p9 = scmp.lt.s32.totalorder %s1711_s4, %s1711_s4 }
 0x284   :  { %p961_p8 = scmp.ne.s32.totalorder %s1711_s4, %s960_s16  ;;  %p966_p10 = scmp.lt.s32.totalorder %s960_s16, %s960_s16 }
 0x286   :  { %p967_p11 = por %p966_p10, %p965_p9 }
 0x288   :  { %p968_p12 = pnand %p967_p11, %p961_p8 }
 0x28a   :  { %971 = shalt.err (!%p968_p12)
}
 0x28b   :  { %s972_s19 = scalar_lea.hbm %s1745_s3, 128 }
 0x28c   :  { %p973_p13 = scmp.ne.s32.totalorder %s1745_s3, %s972_s19  ;;  %p976_p0 = scmp.lt.u32.totalorder %s972_s19, %s1745_s3 }
 0x28e   :  { %p978_p1 = pnand %p976_p0, %p973_p13 }
 0x290   :  { %981 = shalt.err (!%p978_p1)
}
 0x291   :  { %820 = dma.vmem_to_hbm [thread:$0]  %s1711_s4, 128, %s1745_s3, [#allocation5]  }
 0x292   :  { %982 = dma.done.wait [#allocation3], 128  }
 0x293   :  { %983 = vsyncadd [#allocation3], 4294967168 }
 0x294   :  { %984 = dma.done.wait [#allocation5], 128  }
 0x295   :  { %985 = vsyncadd [#allocation5], 4294967168 }
 0x296   :  { %827 = vsyncpa [#allocation3], 1 }
 0x297   :  { %828 = vsyncpa [#allocation5], 1 }

</bundles_post_ra>
